<compile_context>
chip_gen: v5e
topology: v5e:2x2
jax: 0.10.0
libtpu: 0.0.40
codegen_flags: <defaults>
</compile_context>

<pallas_src>
import functools

import jax
import jax.numpy as jnp
import numpy as np
from jax import lax
from jax.experimental import pallas as pl
from jax.experimental.pallas import tpu as pltpu

_LANE = 128


def _joint_term(ref, base, comp):
    """exp(-2*|normalize(v)[comp]|) for the 3-row joint starting at `base`."""
    a = ref[base + 0:base + 1, :]                      # (1, TB)
    b = ref[base + 1:base + 2, :]
    c = ref[base + 2:base + 3, :]
    ssq = a * a + b * b + c * c
    # 1 / max(||v||, 1e-12)  ==  min(rsqrt(ssq), 1e12)  (same ssq<1e-24 cutoff)
    inv = jnp.minimum(lax.rsqrt(ssq), 1e12)
    comp_v = (a, b, c)[comp]
    # exp(-|x|)**2 == exp(-2*|x|)
    return jnp.exp(-2.0 * jnp.abs(comp_v) * inv)       # (1, TB)


def _joint_prior_kernel(*refs, smooth_spine, reduce_lanes, loss_weight, ssw):
    # refs: ja(6,TB), jb(6,TB)[, s2(3,TB), s3(3,TB)], out
    if smooth_spine:
        ja_ref, jb_ref, s2_ref, s3_ref, out_ref = refs
    else:
        ja_ref, jb_ref, out_ref = refs

    # Reference order of the 4 joint terms: pose rows 52, 55, 9, 12
    #   -> joint17 comp1, joint18 comp1, joint3 comp0, joint4 comp0.
    t17 = _joint_term(jb_ref, 0, 1)    # global rows 51-53, comp 52
    t18 = _joint_term(jb_ref, 3, 1)    # global rows 54-56, comp 55
    t3 = _joint_term(ja_ref, 0, 0)     # global rows  9-11, comp 9
    t4 = _joint_term(ja_ref, 3, 0)     # global rows 12-14, comp 12

    if smooth_spine:
        s1 = ja_ref[0:3, :]            # global rows 9-11 (reused, no extra DMA)
        s2 = s2_ref[...]               # global rows 18-20
        s3 = s3_ref[...]               # global rows 27-29
        l12 = (jnp.exp(jnp.maximum(-s1 * s2, 0.0)) - 1.0) ** 2 * ssw
        l23 = (jnp.exp(jnp.maximum(-s2 * s3, 0.0)) - 1.0) ** 2 * ssw

    if reduce_lanes:
        # mean/sum: per-tile (1, TB) lane sums; ragged tail columns never
        # reach HBM (edge block writes are masked), so no iota mask needed.
        lane_sum = t17 + t18 + t3 + t4
        if smooth_spine:
            lane_sum = lane_sum + jnp.sum(l12, axis=0, keepdims=True) \
                                + jnp.sum(l23, axis=0, keepdims=True)
        out_ref[...] = lane_sum
    else:
        # 'none': direct lane-dense row-range stores, no concatenate.
        out_ref[0:1, :] = t17 * loss_weight
        out_ref[1:2, :] = t18 * loss_weight
        out_ref[2:3, :] = t3 * loss_weight
        out_ref[3:4, :] = t4 * loss_weight
        if smooth_spine:
            out_ref[4:7, :] = l12 * loss_weight
            out_ref[7:10, :] = l23 * loss_weight


def joint_prior_loss(body_pose, *, reduction='mean', loss_weight=1.0,
                     smooth_spine=False, smooth_spine_loss_weight=1.0,
                     loss_weight_override=None, reduction_override=None,
                     tb=32768, none_transpose=True):
    """JointPriorLoss forward (use_full_body=False) as a Pallas TPU kernel."""
    assert reduction_override in (None, 'none', 'mean', 'sum')
    reduction = reduction_override if reduction_override else reduction
    loss_weight = (loss_weight_override if loss_weight_override is not None
                   else loss_weight)

    bp = jnp.asarray(body_pose, jnp.float32)
    assert bp.ndim == 2 and bp.shape[1] >= 57
    B = bp.shape[0]
    K = 4 + (6 if smooth_spine else 0)

    # --- Batch tiling: batch on lanes, 128-aligned tiles, no padding. ---
    # Double-buffered footprint at TB=32768: (18 in + <=10 out) rows * 4 B
    # * 2 bufs * TB ~= 7.3 MiB -> safe under every chip's scoped-VMEM default.
    tb = max(_LANE, (int(tb) // _LANE) * _LANE)
    b_up = ((B + _LANE - 1) // _LANE) * _LANE
    TB = min(tb, b_up)
    G = -(-B // TB)

    # --- Lane-major inputs: only the contiguous column runs the loss reads.
    inputs = [bp[:, 9:15].T, bp[:, 51:57].T]            # (6, B) each
    in_specs = [pl.BlockSpec((6, TB), lambda i: (0, i)),
                pl.BlockSpec((6, TB), lambda i: (0, i))]
    if smooth_spine:
        inputs += [bp[:, 18:21].T, bp[:, 27:30].T]      # (3, B) each
        in_specs += [pl.BlockSpec((3, TB), lambda i: (0, i)),
                     pl.BlockSpec((3, TB), lambda i: (0, i))]

    reduce_lanes = reduction in ('mean', 'sum')
    if reduce_lanes:
        out_shape = jax.ShapeDtypeStruct((1, B), jnp.float32)
        out_specs = pl.BlockSpec((1, TB), lambda i: (0, i))
    else:
        out_shape = jax.ShapeDtypeStruct((K, B), jnp.float32)
        out_specs = pl.BlockSpec((K, TB), lambda i: (0, i))

    kernel = functools.partial(
        _joint_prior_kernel,
        smooth_spine=smooth_spine,
        reduce_lanes=reduce_lanes,
        loss_weight=float(loss_weight),
        ssw=float(smooth_spine_loss_weight))

    out = pl.pallas_call(
        kernel,
        out_shape=out_shape,
        grid=(G,),
        in_specs=in_specs,
        out_specs=out_specs,
        compiler_params=pltpu.CompilerParams(
            dimension_semantics=("parallel",),
            allow_input_fusion=[True] * len(inputs)),
    )(*inputs)

    if reduce_lanes:
        total = jnp.sum(out)                             # G tiles' lane sums
        if reduction == 'mean':
            return total * (loss_weight / float(B * K))
        return total * loss_weight
    if none_transpose:
        return jnp.transpose(out)                        # (B, K), reference layout
    return out                                           # (K, B), lane-major


def _reference(body_pose, *, reduction='mean', loss_weight=1.0,
               smooth_spine=False, smooth_spine_loss_weight=1.0):
    """Pure-JAX reimplementation of the PyTorch forward (use_full_body=False)."""
    body_pose = jnp.asarray(body_pose, jnp.float32)
    B = body_pose.shape[0]
    x = body_pose.reshape(B, -1, 3)
    n = jnp.maximum(jnp.sqrt(jnp.sum(x * x, axis=2, keepdims=True)), 1e-12)
    pn = (x / n).reshape(B, -1)
    jp = jnp.exp(-jnp.abs(pn[:, jnp.array([55 - 3, 58 - 3, 12 - 3, 15 - 3])])) ** 2
    if smooth_spine:
        s1 = body_pose[:, 9:12]
        s2 = body_pose[:, 18:21]
        s3 = body_pose[:, 27:30]
        l12 = (jnp.exp(jax.nn.relu(-s1 * s2)) - 1.0) ** 2 * smooth_spine_loss_weight
        l23 = (jnp.exp(jax.nn.relu(-s2 * s3)) - 1.0) ** 2 * smooth_spine_loss_weight
        jp = jnp.concatenate([jp, l12, l23], axis=1)
    jp = loss_weight * jp
    if reduction == 'mean':
        return jp.mean()
    if reduction == 'sum':
        return jp.sum()
    return jp


if __name__ == "__main__":
    key = jax.random.PRNGKey(0)
    # SMPL body_pose: 23 joints x 3 axis-angle components = 69.
    body_pose = jax.random.normal(key, (2, 69), dtype=jnp.float32) * 0.5

    # 1) Default config: reduction='mean', loss_weight=1.0, no smooth spine.
    out = jax.block_until_ready(joint_prior_loss(body_pose))
    ref = _reference(body_pose)
    np.testing.assert_allclose(np.asarray(out), np.asarray(ref),
                               rtol=1e-5, atol=1e-6)

    # 2) smooth_spine branch, mean reduction.
    out_ss = jax.block_until_ready(
        joint_prior_loss(body_pose, smooth_spine=True,
                         smooth_spine_loss_weight=2.0, loss_weight=0.5))
    ref_ss = _reference(body_pose, smooth_spine=True,
                        smooth_spine_loss_weight=2.0, loss_weight=0.5)
    np.testing.assert_allclose(np.asarray(out_ss), np.asarray(ref_ss),
                               rtol=1e-5, atol=1e-6)

    # 3) reduction='none' (lane-dense direct row stores), smooth_spine on.
    out_none = jax.block_until_ready(
        joint_prior_loss(body_pose, reduction='none', smooth_spine=True,
                         smooth_spine_loss_weight=2.0, loss_weight=0.5))
    ref_none = _reference(body_pose, reduction='none', smooth_spine=True,
                          smooth_spine_loss_weight=2.0, loss_weight=0.5)
    np.testing.assert_allclose(np.asarray(out_none), np.asarray(ref_none),
                               rtol=1e-5, atol=1e-6)

    # 3b) lane-major 'none' output (skips the final transpose HBM pass).
    out_none_km = jax.block_until_ready(
        joint_prior_loss(body_pose, reduction='none', smooth_spine=True,
                         smooth_spine_loss_weight=2.0, loss_weight=0.5,
                         none_transpose=False))
    np.testing.assert_allclose(np.asarray(out_none_km).T, np.asarray(ref_none),
                               rtol=1e-5, atol=1e-6)

    # 4) Multi-tile grid + ragged last block (B=300, TB=128 -> grid=(3,),
    #    last block has 44 valid lanes) + per-tile-partial reduction path.
    key2 = jax.random.PRNGKey(0)
    body_big = jax.random.normal(key2, (300, 69), dtype=jnp.float32) * 0.5
    out_big = jax.block_until_ready(
        joint_prior_loss(body_big, smooth_spine=True, tb=128))
    ref_big = _reference(body_big, smooth_spine=True)
    np.testing.assert_allclose(np.asarray(out_big), np.asarray(ref_big),
                               rtol=1e-5, atol=1e-5)

    out_big_sum = jax.block_until_ready(
        joint_prior_loss(body_big, reduction='sum', tb=128))
    ref_big_sum = _reference(body_big, reduction='sum')
    np.testing.assert_allclose(np.asarray(out_big_sum), np.asarray(ref_big_sum),
                               rtol=1e-5, atol=1e-5)

    out_big_none = jax.block_until_ready(
        joint_prior_loss(body_big, reduction='none', smooth_spine=True, tb=128))
    ref_big_none = _reference(body_big, reduction='none', smooth_spine=True)
    np.testing.assert_allclose(np.asarray(out_big_none), np.asarray(ref_big_none),
                               rtol=1e-5, atol=1e-6)

    # 5) Default (large) tile path with a batch that is not lane-aligned.
    out_big_def = jax.block_until_ready(joint_prior_loss(body_big))
    ref_big_def = _reference(body_big)
    np.testing.assert_allclose(np.asarray(out_big_def), np.asarray(ref_big_def),
                               rtol=1e-5, atol=1e-5)

    print("KERNEL_OK")
</pallas_src>

<mosaic_0001>
module attributes {stable_mosaic.version = 11 : i64} {
  func.func @_joint_prior_kernel(%arg0: i32, %arg1: memref<6x128xf32, #tpu.memory_space<vmem>>, %arg2: memref<6x128xf32, #tpu.memory_space<vmem>>, %arg3: memref<1x128xf32, #tpu.memory_space<vmem>>) attributes {dimension_semantics = [#tpu.dimension_semantics<parallel>], iteration_bounds = array<i64: 1>, scalar_prefetch = 0 : i64, scratch_operands = 0 : i64, tpu.core_type = #tpu.core_type<tc>, window_params = [{transform_indices = @transform_0, window_bounds = array<i64: 6, 128>}, {transform_indices = @transform_1, window_bounds = array<i64: 6, 128>}, {transform_indices = @transform_2, window_bounds = array<i64: 1, 128>}]} {
    %c0 = arith.constant 0 : index
    %c0_0 = arith.constant 0 : index
    %0 = vector.load %arg2[%c0, %c0_0] : memref<6x128xf32, #tpu.memory_space<vmem>>, vector<1x128xf32>
    %c1 = arith.constant 1 : index
    %c0_1 = arith.constant 0 : index
    %1 = vector.load %arg2[%c1, %c0_1] : memref<6x128xf32, #tpu.memory_space<vmem>>, vector<1x128xf32>
    %c2 = arith.constant 2 : index
    %c0_2 = arith.constant 0 : index
    %2 = vector.load %arg2[%c2, %c0_2] : memref<6x128xf32, #tpu.memory_space<vmem>>, vector<1x128xf32>
    %3 = arith.mulf %0, %0 : vector<1x128xf32>
    %4 = arith.mulf %1, %1 : vector<1x128xf32>
    %5 = arith.addf %3, %4 : vector<1x128xf32>
    %6 = arith.mulf %2, %2 : vector<1x128xf32>
    %7 = arith.addf %5, %6 : vector<1x128xf32>
    %8 = math.rsqrt %7 : vector<1x128xf32>
    %cst = arith.constant 9.99999995E+11 : f32
    %9 = vector.broadcast %cst : f32 to vector<1x128xf32>
    %10 = arith.minimumf %8, %9 : vector<1x128xf32>
    %11 = math.absf %1 : vector<1x128xf32>
    %cst_3 = arith.constant -2.000000e+00 : f32
    %12 = vector.broadcast %cst_3 : f32 to vector<1x128xf32>
    %13 = arith.mulf %12, %11 : vector<1x128xf32>
    %14 = arith.mulf %13, %10 : vector<1x128xf32>
    %15 = math.exp %14 : vector<1x128xf32>
    %c3 = arith.constant 3 : index
    %c0_4 = arith.constant 0 : index
    %16 = vector.load %arg2[%c3, %c0_4] : memref<6x128xf32, #tpu.memory_space<vmem>>, vector<1x128xf32>
    %c4 = arith.constant 4 : index
    %c0_5 = arith.constant 0 : index
    %17 = vector.load %arg2[%c4, %c0_5] : memref<6x128xf32, #tpu.memory_space<vmem>>, vector<1x128xf32>
    %c5 = arith.constant 5 : index
    %c0_6 = arith.constant 0 : index
    %18 = vector.load %arg2[%c5, %c0_6] : memref<6x128xf32, #tpu.memory_space<vmem>>, vector<1x128xf32>
    %19 = arith.mulf %16, %16 : vector<1x128xf32>
    %20 = arith.mulf %17, %17 : vector<1x128xf32>
    %21 = arith.addf %19, %20 : vector<1x128xf32>
    %22 = arith.mulf %18, %18 : vector<1x128xf32>
    %23 = arith.addf %21, %22 : vector<1x128xf32>
    %24 = math.rsqrt %23 : vector<1x128xf32>
    %cst_7 = arith.constant 9.99999995E+11 : f32
    %25 = vector.broadcast %cst_7 : f32 to vector<1x128xf32>
    %26 = arith.minimumf %24, %25 : vector<1x128xf32>
    %27 = math.absf %17 : vector<1x128xf32>
    %cst_8 = arith.constant -2.000000e+00 : f32
    %28 = vector.broadcast %cst_8 : f32 to vector<1x128xf32>
    %29 = arith.mulf %28, %27 : vector<1x128xf32>
    %30 = arith.mulf %29, %26 : vector<1x128xf32>
    %31 = math.exp %30 : vector<1x128xf32>
    %c0_9 = arith.constant 0 : index
    %c0_10 = arith.constant 0 : index
    %32 = vector.load %arg1[%c0_9, %c0_10] : memref<6x128xf32, #tpu.memory_space<vmem>>, vector<1x128xf32>
    %c1_11 = arith.constant 1 : index
    %c0_12 = arith.constant 0 : index
    %33 = vector.load %arg1[%c1_11, %c0_12] : memref<6x128xf32, #tpu.memory_space<vmem>>, vector<1x128xf32>
    %c2_13 = arith.constant 2 : index
    %c0_14 = arith.constant 0 : index
    %34 = vector.load %arg1[%c2_13, %c0_14] : memref<6x128xf32, #tpu.memory_space<vmem>>, vector<1x128xf32>
    %35 = arith.mulf %32, %32 : vector<1x128xf32>
    %36 = arith.mulf %33, %33 : vector<1x128xf32>
    %37 = arith.addf %35, %36 : vector<1x128xf32>
    %38 = arith.mulf %34, %34 : vector<1x128xf32>
    %39 = arith.addf %37, %38 : vector<1x128xf32>
    %40 = math.rsqrt %39 : vector<1x128xf32>
    %cst_15 = arith.constant 9.99999995E+11 : f32
    %41 = vector.broadcast %cst_15 : f32 to vector<1x128xf32>
    %42 = arith.minimumf %40, %41 : vector<1x128xf32>
    %43 = math.absf %32 : vector<1x128xf32>
    %cst_16 = arith.constant -2.000000e+00 : f32
    %44 = vector.broadcast %cst_16 : f32 to vector<1x128xf32>
    %45 = arith.mulf %44, %43 : vector<1x128xf32>
    %46 = arith.mulf %45, %42 : vector<1x128xf32>
    %47 = math.exp %46 : vector<1x128xf32>
    %c3_17 = arith.constant 3 : index
    %c0_18 = arith.constant 0 : index
    %48 = vector.load %arg1[%c3_17, %c0_18] : memref<6x128xf32, #tpu.memory_space<vmem>>, vector<1x128xf32>
    %c4_19 = arith.constant 4 : index
    %c0_20 = arith.constant 0 : index
    %49 = vector.load %arg1[%c4_19, %c0_20] : memref<6x128xf32, #tpu.memory_space<vmem>>, vector<1x128xf32>
    %c5_21 = arith.constant 5 : index
    %c0_22 = arith.constant 0 : index
    %50 = vector.load %arg1[%c5_21, %c0_22] : memref<6x128xf32, #tpu.memory_space<vmem>>, vector<1x128xf32>
    %51 = arith.mulf %48, %48 : vector<1x128xf32>
    %52 = arith.mulf %49, %49 : vector<1x128xf32>
    %53 = arith.addf %51, %52 : vector<1x128xf32>
    %54 = arith.mulf %50, %50 : vector<1x128xf32>
    %55 = arith.addf %53, %54 : vector<1x128xf32>
    %56 = math.rsqrt %55 : vector<1x128xf32>
    %cst_23 = arith.constant 9.99999995E+11 : f32
    %57 = vector.broadcast %cst_23 : f32 to vector<1x128xf32>
    %58 = arith.minimumf %56, %57 : vector<1x128xf32>
    %59 = math.absf %48 : vector<1x128xf32>
    %cst_24 = arith.constant -2.000000e+00 : f32
    %60 = vector.broadcast %cst_24 : f32 to vector<1x128xf32>
    %61 = arith.mulf %60, %59 : vector<1x128xf32>
    %62 = arith.mulf %61, %58 : vector<1x128xf32>
    %63 = math.exp %62 : vector<1x128xf32>
    %64 = arith.addf %15, %31 : vector<1x128xf32>
    %65 = arith.addf %64, %47 : vector<1x128xf32>
    %66 = arith.addf %65, %63 : vector<1x128xf32>
    %c0_25 = arith.constant 0 : index
    %c0_26 = arith.constant 0 : index
    %67 = vector.load %arg3[%c0_25, %c0_26] : memref<1x128xf32, #tpu.memory_space<vmem>>, vector<1x128xf32>
    tpu.vector_store %arg3[%c0_25, %c0_26], %66 {strides = array<i32>} : memref<1x128xf32, #tpu.memory_space<vmem>>, vector<1x128xf32>,
    return
  }
  func.func @transform_0(%arg0: i32) -> (i32, i32) {
    %c0_i32 = arith.constant 0 : i32
    %c0_i32_0 = arith.constant 0 : i32
    return %c0_i32, %arg0 : i32, i32
  }
  func.func @transform_1(%arg0: i32) -> (i32, i32) {
    %c0_i32 = arith.constant 0 : i32
    %c0_i32_0 = arith.constant 0 : i32
    return %c0_i32, %arg0 : i32, i32
  }
  func.func @transform_2(%arg0: i32) -> (i32, i32) {
    %c0_i32 = arith.constant 0 : i32
    %c0_i32_0 = arith.constant 0 : i32
    return %c0_i32, %arg0 : i32, i32
  }
}

</mosaic_0001>

<bundles_post_ra>
// kernel: tpu_custom_call.1
= control target key start
LH: loop header
LB: loop body
LE: loop exit
PB: predicated region body
PF: predicated region fallthrough
CT: control target
= control target key end

     0   :  { %s258_s0 = inlined_call_operand.vmem [shape: f32[6,2], index: 0, kind: input, shape index: {}]   ;;  %s259_s1 = inlined_call_operand.vmem [shape: f32[6,2], index: 1, kind: input, shape index: {}]   ;;  %s260_s2 = inlined_call_operand.hbm [shape: f32[1,2], index: 2, kind: output, shape index: {}]  }
   0x1   :  { %v12_v0 = vld [vmem:[%s259_s1] sm:$0x1]  ;;  %v193_v1 = vld [vmem:[%s259_s1 + $0x1] sm:$0x1]  ;;  %v14_v2 = vld [vmem:[%s259_s1 + $0x2] sm:$0x1] }
   0x2   :  { %v15_v3 = vmul.f32 %v12_v0, %v12_v0  ;;  %v16_v4 = vmul.f32 %v193_v1, %v193_v1  ;;  %v18_v5 = vmul.f32 %v14_v2, %v14_v2  ;;  %v36_v6 = vld [vmem:[%s259_s1 + $0x3] sm:$0x1]  ;;  %v206_v7 = vld [vmem:[%s259_s1 + $0x4] sm:$0x1]  ;;  %v38_v8 = vld [vmem:[%s259_s1 + $0x5] sm:$0x1] }
   0x3   :  { %v39_v9 = vmul.f32 %v36_v6, %v36_v6  ;;  %v40_v10 = vmul.f32 %v206_v7, %v206_v7  ;;  %v216_v11 = vld [vmem:[%s258_s0] sm:$0x1]  ;;  %v42_v13 = vmul.f32 %v38_v8, %v38_v8  ;;  %v61_v14 = vld [vmem:[%s258_s0 + $0x1] sm:$0x1]  ;;  %v62_v15 = vld [vmem:[%s258_s0 + $0x2] sm:$0x1] }
   0x4   :  { %v17_v12 = vadd.f32 %v16_v4, %v15_v3  ;;  %v63_v16 = vmul.f32 %v216_v11, %v216_v11  ;;  %v64_v18 = vmul.f32 %v61_v14, %v61_v14  ;;  %v66_v19 = vmul.f32 %v62_v15, %v62_v15  ;;  %v229_v20 = vld [vmem:[%s258_s0 + $0x3] sm:$0x1]  ;;  %v85_v21 = vld [vmem:[%s258_s0 + $0x4] sm:$0x1]  ;;  %v86_v23 = vld [vmem:[%s258_s0 + $0x5] sm:$0x1] }
   0x5   :  { %v41_v17 = vadd.f32 %v40_v10, %v39_v9  ;;  %v87_v24 = vmul.f32 %v229_v20, %v229_v20  ;;  %v88_v25 = vmul.f32 %v85_v21, %v85_v21 }
   0x6   :  { %v19_v22 = vadd.f32 %v18_v5, %v17_v12 }
   0x7   :  { %7 = vsyncpa [#allocation3], 0  ;;  %v43_v26 = vadd.f32 %v42_v13, %v41_v17  ;;  %v65_v27 = vadd.f32 %v64_v18, %v63_v16  ;;  %v90_v28 = vmul.f32 %v86_v23, %v86_v23  ;;  %v89_v29 = vadd.f32 %v88_v25, %v87_v24  ;;  %s171_s0 = smov [#allocation2]   ;;  %s119_s7 = sshll.u32 %s260_s2, 4  ;;  %s120_s7 = int_to_ptr.hbm [resolvable:$true] %s119_s7 }
   0x8   :  { %129 = vrsqrt.f32 %v19_v22  ;;  %v31_v39 = vand.u32 2147483647, %v193_v1  ;;  %vm26_vm0 = vweird.f32 %v19_v22  ;;  %v55_v47 = vand.u32 2147483647, %v206_v7  ;;  %s117_s4 = sshll.u32 %s171_s0, 4  ;;  %s118_s4 = int_to_ptr.vmem [resolvable:$true] %s117_s4 }
   0x9   :  { %131 = vrsqrt.f32 %v43_v26  ;;  %v67_v30 = vadd.f32 %v66_v19, %v65_v27  ;;  %v91_v31 = vadd.f32 %v90_v28, %v89_v29  ;;  %vm50_vm2 = vweird.f32 %v43_v26 }
   0xa   :  { %v79_v48 = vand.u32 2147483647, %v216_v11  ;;  %v32_v56 = vmul.f32 -2.0, %v31_v39  ;;  %v103_v59 = vand.u32 2147483647, %v229_v20  ;;  %v56_v61 = vmul.f32 -2.0, %v55_v47 }
   0xb   :  { %133 = vrsqrt.f32 %v67_v30  ;;  %vm74_vm5 = vweird.f32 %v67_v30  ;;  %vm98_vm8 = vweird.f32 %v91_v31 }
   0xc   :  { %135 = vrsqrt.f32 %v91_v31  ;;  %v80_v3 = vmul.f32 -2.0, %v79_v48  ;;  %v104_v7 = vmul.f32 -2.0, %v103_v59 }
   0xe   :  { %v130_v32 = vpop.eup %129 }
   0xf   :  { %v132_v33 = vpop.eup %131  ;;  %v21_v34 = vmul.f32 %v130_v32, %v19_v22  ;;  %vm27_vm1 = vweird.f32 %v130_v32 }
  0x10   :  { %v45_v35 = vmul.f32 %v132_v33, %v43_v26  ;;  %vm51_vm3 = vweird.f32 %v132_v33  ;;  %vm242_vm4 = vmor %vm26_vm0, %vm27_vm1 }
  0x11   :  { %v134_v36 = vpop.eup %133  ;;  %v22_v37 = vmul.f32 %v130_v32, %v21_v34  ;;  %vm246_vm7 = vmor %vm50_vm2, %vm51_vm3 }
  0x12   :  { %v136_v38 = vpop.eup %135  ;;  %v46_v40 = vmul.f32 %v132_v33, %v45_v35  ;;  %v69_v41 = vmul.f32 %v134_v36, %v67_v30  ;;  %vm75_vm6 = vweird.f32 %v134_v36 }
  0x13   :  { %v23_v42 = vmul.f32 0.5, %v22_v37  ;;  %v93_v43 = vmul.f32 %v136_v38, %v91_v31  ;;  %vm99_vm9 = vweird.f32 %v136_v38  ;;  %vm76_vm10 = vmor %vm74_vm5, %vm75_vm6 }
  0x14   :  { %v47_v44 = vmul.f32 0.5, %v46_v40  ;;  %v70_v45 = vmul.f32 %v134_v36, %v69_v41  ;;  %vm100_vm11 = vmor %vm98_vm8, %vm99_vm9 }
  0x15   :  { %v24_v46 = vsub.f32 1.5, %v23_v42  ;;  %v94_v49 = vmul.f32 %v136_v38, %v93_v43 }
  0x16   :  { %v48_v51 = vsub.f32 1.5, %v47_v44  ;;  %v71_v52 = vmul.f32 0.5, %v70_v45 }
  0x17   :  { %v25_v53 = vmul.f32 %v130_v32, %v24_v46  ;;  %v95_v55 = vmul.f32 0.5, %v94_v49 }
  0x18   :  { %v49_v57 = vmul.f32 %v132_v33, %v48_v51  ;;  %v72_v58 = vsub.f32 1.5, %v71_v52 }
  0x19   :  { %v29_v60 = vsel %vm242_vm4, %v130_v32, %v25_v53  ;;  %v96_v62 = vsub.f32 1.5, %v95_v55 }
  0x1a   :  { %v30_v63 = vmin.f32 %v29_v60, 1e+12  ;;  %v53_v0 = vsel %vm246_vm7, %v132_v33, %v49_v57  ;;  %v73_v1 = vmul.f32 %v134_v36, %v72_v58 }
  0x1b   :  { %v54_v2 = vmin.f32 %v53_v0, 1e+12  ;;  %v97_v4 = vmul.f32 %v136_v38, %v96_v62 }
  0x1c   :  { %v33_v5 = vmul.f32 %v32_v56, %v30_v63  ;;  %v77_v6 = vsel %vm76_vm10, %v134_v36, %v73_v1 }
  0x1d   :  { %v57_v8 = vmul.f32 %v56_v61, %v54_v2  ;;  %v78_v9 = vmin.f32 %v77_v6, 1e+12  ;;  %v101_v10 = vsel %vm100_vm11, %v136_v38, %v97_v4 }
  0x1e   :  { %v34_v11 = vmul.f32 1.442695, %v33_v5  ;;  %v102_v12 = vmin.f32 %v101_v10, 1e+12 }
  0x1f   :  { %v58_v13 = vmul.f32 1.442695, %v57_v8  ;;  %v81_v14 = vmul.f32 %v80_v3, %v78_v9 }
  0x20   :  { %137 = vpow2.f32 %v34_v11  ;;  %v105_v15 = vmul.f32 %v104_v7, %v102_v12 }
  0x21   :  { %139 = vpow2.f32 %v58_v13  ;;  %v82_v16 = vmul.f32 1.442695, %v81_v14 }
  0x22   :  { %v106_v17 = vmul.f32 1.442695, %v105_v15 }
  0x23   :  { %141 = vpow2.f32 %v82_v16 }
  0x24   :  { %143 = vpow2.f32 %v106_v17 }
  0x26   :  { %v138_v18 = vpop.eup %137 }
  0x27   :  { %v140_v19 = vpop.eup %139 }
  0x28   :  { %v108_v20 = vadd.f32 %v140_v19, %v138_v18 }
  0x29   :  { %v142_v21 = vpop.eup %141 }
  0x2a   :  { %v144_v22 = vpop.eup %143  ;;  %v109_v23 = vadd.f32 %v142_v21, %v108_v20 }
  0x2c   :  { %v110_v24 = vadd.f32 %v144_v22, %v109_v23 }
  0x2e   :  { %111 = vst [vmem:[#allocation2] sm:$0x1] %v110_v24 }
  0x2f   :  { %122 = dma.vmem_to_hbm [thread:$0]  %s118_s4, 16, %s120_s7, [#allocation3]  }
  0x30   :  { %169 = dma.done.wait [#allocation3], 16  }
  0x31   :  { %170 = vsyncadd [#allocation3], 4294967280 }
  0x32   :  { %127 = vsyncpa [#allocation3], 1 }

</bundles_post_ra>
